<compile_context>
chip_gen: v7x
topology: tpu7x:2x2x1
jax: 0.10.0
libtpu: 0.0.40
codegen_flags: <defaults>
</compile_context>

<pallas_src>
import functools

import jax
import jax.numpy as jnp
import numpy as np
from jax import lax
from jax.experimental import pallas as pl
from jax.experimental.pallas import tpu as pltpu


# ---------------------------------------------------------------------------
# activation (usable both inside Pallas kernels and in the plain-JAX reference)
# ---------------------------------------------------------------------------
def _apply_activation(x, activation):
    if activation == "relu":
        return jnp.maximum(x, 0.0)
    elif activation == "tanh":
        return jnp.tanh(x)
    elif activation == "selu":
        alpha = 1.6732632423543772
        scale = 1.0507009873554805
        return scale * jnp.where(x > 0, x, alpha * (jnp.exp(x) - 1.0))
    else:
        raise ValueError("Enter correct activation ( relu, tanh and selu accepted )")


# ---------------------------------------------------------------------------
# static (numpy) index / selector helpers — shape-only, cached
# ---------------------------------------------------------------------------
@functools.lru_cache(maxsize=None)
def _conv1_gathered_indices(n, h0, w0, h2, w2):
    """Flat input-pixel indices for conv1's im2col, emitted directly in conv2's
    im2col column order (conv2-tap major, conv2-output-pixel minor).  Folding
    conv2's gather into this index set removes the big conv2 selector."""
    m2 = n * h2 * w2
    idx = np.zeros((9, 9 * m2), np.int32)
    for t2 in range(9):
        kh2, kw2 = divmod(t2, 3)
        for nn in range(n):
            for i2 in range(h2):
                for j2 in range(w2):
                    col = t2 * m2 + (nn * h2 + i2) * w2 + j2
                    i1 = 2 * i2 + kh2            # conv1 output row feeding this tap
                    j1 = 2 * j2 + kw2
                    for t1 in range(9):
                        kh1, kw1 = divmod(t1, 3)
                        idx[t1, col] = (nn * h0 + 2 * i1 + kh1) * w0 + (2 * j1 + kw1)
    return idx


@functools.lru_cache(maxsize=None)
def _selector_wide(n, hi, wi, ho, wo):
    """0/1 gather matrix (N*hi*wi, 9*N*ho*wo): column (t*Mo + m_out) selects the
    input pixel feeding output pixel m_out at tap t of a stride-2 VALID 3x3 conv."""
    mi = n * hi * wi
    mo = n * ho * wo
    g = np.zeros((mi, 9 * mo), np.float32)
    for t in range(9):
        kh, kw = divmod(t, 3)
        for nn in range(n):
            for i in range(ho):
                for j in range(wo):
                    m_out = (nn * ho + i) * wo + j
                    m_in = (nn * hi + 2 * i + kh) * wi + (2 * j + kw)
                    g[m_in, t * mo + m_out] = 1.0
    return g


# ---------------------------------------------------------------------------
# the single fused kernel: conv1..conv4 + classifier head + trace update
# ---------------------------------------------------------------------------
def _fused_forward_kernel(cols1g_ref, w1_ref, b1_ref,
                          w2_ref, b2_ref,
                          gt3_ref, w3_ref, b3_ref,
                          gt4_ref, w4_ref, b4_ref,
                          wcls_ref, alpha_ref, trace_ref, label_ref, eta_ref,
                          feat_ref, activout_ref, trace_out_ref,
                          *, activation, batch, nf, m2, m3, m4):
    f32 = jnp.float32

    def conv_from_gathered(g, mo, w_ref, b_ref):
        # g: (F, 9*mo) — previous layer's activations already in im2col
        # (tap-major) column order.  Stack the 9 tap blocks on sublanes and
        # apply the whole 3x3xFxF kernel as ONE (F, 9F) @ (9F, mo) matmul.
        a_all = jnp.concatenate([g[:, t * mo:(t + 1) * mo] for t in range(9)],
                                axis=0)                                  # (9F, mo)
        z = jnp.dot(w_ref[...], a_all, preferred_element_type=f32)      # (F, mo)
        return _apply_activation(z + b_ref[...], activation)

    # ---- conv1: computed directly in conv2-gathered column order (F, 9*m2) --
    z1 = jnp.dot(w1_ref[...], cols1g_ref[...], preferred_element_type=f32)
    g1 = _apply_activation(z1 + b1_ref[...], activation)                # (F, 9*m2)

    # ---- conv2 (no selector needed) ------------------------------------------
    a2 = conv_from_gathered(g1, m2, w2_ref, b2_ref)                     # (F, m2)

    # ---- conv3: one gather matmul + one fused weight matmul ------------------
    g2 = jnp.dot(a2, gt3_ref[...], preferred_element_type=f32)          # (F, 9*m3)
    a3 = conv_from_gathered(g2, m3, w3_ref, b3_ref)                     # (F, m3)

    # ---- conv4 ---------------------------------------------------------------
    g3 = jnp.dot(a3, gt4_ref[...], preferred_element_type=f32)          # (F, 9*m4)
    feat_t = conv_from_gathered(g3, m4, w4_ref, b4_ref)                 # (F, N)

    # ---- feature_activ in natural (N, F) orientation ------------------------
    # Move each (F, 1) column to a (1, F) row with a masked sublane reduce
    # (F x F intermediates are tiny; avoids an in-kernel transpose op).
    row_i = lax.broadcasted_iota(jnp.int32, (nf, nf), 0)
    col_i = lax.broadcasted_iota(jnp.int32, (nf, nf), 1)
    eye_f = (row_i == col_i).astype(f32)                                 # (F, F)
    rows = [jnp.sum(eye_f * feat_t[:, i:i + 1], axis=0, keepdims=True)
            for i in range(batch)]
    feat_nat = jnp.concatenate(rows, axis=0)                             # (N, F)
    feat_ref[...] = feat_nat

    # ---- classifier head ------------------------------------------------------
    weff = wcls_ref[...] + alpha_ref[...] * trace_ref[...]               # (F, C)
    activout = jnp.dot(feat_nat, weff, preferred_element_type=f32)       # (N, C)
    activout = activout + 1000.0 * label_ref[...]
    activout_ref[...] = activout

    # ---- Hebbian trace update (sample 0, as in the reference module) ---------
    f0 = feat_t[:, 0:1]                                                  # (F, 1)
    a0 = activout[0:1, :]                                                # (1, C)
    eta = eta_ref[0]
    trace = trace_ref[...]
    trace_out_ref[...] = trace + eta * (f0 - trace * a0) * a0


# ---------------------------------------------------------------------------
# Network.forward
# ---------------------------------------------------------------------------
def network_forward(params, hp, x, inputlabel, trace):
    act = hp["activation"]
    F = hp["no_filters"]
    C = hp["no_classes"]
    N, cin, H, W = x.shape
    assert cin == 1, "first conv expects a single input channel"

    # spatial sizes after each stride-2 VALID 3x3 conv
    hs, ws = [H], [W]
    for _ in range(4):
        hs.append((hs[-1] - 3) // 2 + 1)
        ws.append((ws[-1] - 3) // 2 + 1)
    # torch's x.view(-1, no_filters) only matches a plain (N, F) reshape when
    # the final spatial size is 1x1 (true for 32x32 inputs).
    assert hs[4] == 1 and ws[4] == 1, "head assumes 1x1 final spatial extent"
    m = [N * hs[i] * ws[i] for i in range(5)]
    m2, m3, m4 = m[2], m[3], m[4]

    # ---- layer-1 im2col gathered straight into conv2's im2col column order ---
    idx1g = jnp.asarray(_conv1_gathered_indices(N, H, W, hs[2], ws[2]))
    cols1g = jnp.take(x.reshape(-1), idx1g, axis=0)                      # (9, 9*m2)

    # ---- tiny 0/1 gather matrices for conv3/conv4 (conv2's is folded above) --
    gt3 = jnp.asarray(_selector_wide(N, hs[2], ws[2], hs[3], ws[3]))     # (m2, 9*m3)
    gt4 = jnp.asarray(_selector_wide(N, hs[3], ws[3], hs[4], ws[4]))     # (m3, 9*m4)
    # TODO(synk): for large batches switch gt3/gt4 to the per-sample
    # (block-diagonal) form and add a batch grid axis with
    # dimension_semantics=("parallel",...) to use v7x's 2nd TensorCore; at
    # N=2 the full-batch selectors total < 70 KB so it is irrelevant here.

    # ---- weights in matmul layout (shape-only prep on tiny tensors) ----------
    w1, b1 = params["cv1"]
    inputs = [cols1g, w1.reshape(F, 9), b1.reshape(F, 1)]
    wcats = {}
    for name in ("cv2", "cv3", "cv4"):
        wl, bl = params[name]
        # W_cat[fo, t*F + fi] = w[fo, fi, kh, kw],  t = kh*3 + kw
        wcat = jnp.transpose(wl.reshape(F, F, 9), (0, 2, 1)).reshape(F, 9 * F)
        wcats[name] = (wcat, bl.reshape(F, 1))
    inputs += [wcats["cv2"][0], wcats["cv2"][1],
               gt3, wcats["cv3"][0], wcats["cv3"][1],
               gt4, wcats["cv4"][0], wcats["cv4"][1],
               params["w"], params["alpha"], trace, inputlabel, params["eta"]]

    vmem = pl.BlockSpec(memory_space=pltpu.MemorySpace.VMEM)
    smem = pl.BlockSpec(memory_space=pltpu.MemorySpace.SMEM)
    in_specs = [vmem] * (len(inputs) - 1) + [smem]                       # eta in SMEM

    # advisory cost estimate for XLA scheduling around the custom call
    flops = 2 * F * 9 * (9 * m2)            # conv1 (in gathered order)
    flops += 2 * F * (9 * F) * m2           # conv2 fused-tap matmul
    flops += 2 * F * m2 * (9 * m3)          # conv3 gather matmul
    flops += 2 * F * (9 * F) * m3           # conv3 fused-tap matmul
    flops += 2 * F * m3 * (9 * m4)          # conv4 gather matmul
    flops += 2 * F * (9 * F) * m4           # conv4 fused-tap matmul
    flops += 2 * N * F * C + 6 * F * C      # head + trace update
    transcendentals = 0 if act == "relu" else (9 * m2 + m2 + m3 + m4) * F
    bytes_accessed = int(sum(int(np.prod(a.shape)) * a.dtype.itemsize for a in inputs)
                         + 4 * (N * F + N * C + F * C))

    feat, activout, new_trace = pl.pallas_call(
        functools.partial(_fused_forward_kernel, activation=act, batch=N, nf=F,
                          m2=m2, m3=m3, m4=m4),
        out_shape=(
            jax.ShapeDtypeStruct((N, F), jnp.float32),                   # feature_activ
            jax.ShapeDtypeStruct((N, C), jnp.float32),                   # activout
            jax.ShapeDtypeStruct((F, C), jnp.float32),                   # updated trace
        ),
        in_specs=in_specs,
        out_specs=(vmem, vmem, vmem),
        compiler_params=pltpu.CompilerParams(vmem_limit_bytes=4 * 1024 * 1024),
        cost_estimate=pl.CostEstimate(flops=int(flops),
                                      transcendentals=int(transcendentals),
                                      bytes_accessed=bytes_accessed),
    )(*inputs)

    return feat, activout, new_trace


# ---------------------------------------------------------------------------
# parameter init (deterministic, mirrors the shapes in Network.__init__)
# ---------------------------------------------------------------------------
def init_params(key, no_filters, no_classes):
    ks = jax.random.split(key, 6)

    def conv_init(k, cout, cin):
        kw, kb = jax.random.split(k)
        fan_in = cin * 9
        bound = 1.0 / np.sqrt(fan_in)
        w = jax.random.uniform(kw, (cout, cin, 3, 3), jnp.float32, -bound, bound)
        b = jax.random.uniform(kb, (cout,), jnp.float32, -bound, bound)
        return w, b

    return {
        "cv1": conv_init(ks[0], no_filters, 1),
        "cv2": conv_init(ks[1], no_filters, no_filters),
        "cv3": conv_init(ks[2], no_filters, no_filters),
        "cv4": conv_init(ks[3], no_filters, no_filters),
        "w": 0.01 * jax.random.normal(ks[4], (no_filters, no_classes), jnp.float32),
        "alpha": 0.01 * jax.random.uniform(ks[5], (no_filters, no_classes), jnp.float32),
        "eta": jnp.full((1,), 0.01, jnp.float32),
    }


# ---------------------------------------------------------------------------
# plain-JAX reference (for the sanity check)
# ---------------------------------------------------------------------------
def reference_forward(params, hp, x, inputlabel, trace):
    act = hp["activation"]

    def conv(x, w, b):
        y = jax.lax.conv_general_dilated(
            x, w, (2, 2), "VALID",
            dimension_numbers=("NCHW", "OIHW", "NCHW"),
            precision=jax.lax.Precision.HIGHEST)
        return _apply_activation(y + b[None, :, None, None], act)

    for name in ("cv1", "cv2", "cv3", "cv4"):
        x = conv(x, *params[name])
    feat = x.reshape(-1, hp["no_filters"])
    activout = feat @ (params["w"] + params["alpha"] * trace) + 1000.0 * inputlabel
    a0 = activout[0:1, :]
    f0 = feat[0][:, None]
    new_trace = trace + params["eta"][0] * (f0 - trace * a0) * a0
    return feat, activout, new_trace


if __name__ == "__main__":
    hp = {"no_filters": 8, "no_classes": 4, "activation": "relu"}

    key = jax.random.PRNGKey(0)
    kp, kx, kl, kt = jax.random.split(key, 4)
    params = init_params(kp, hp["no_filters"], hp["no_classes"])

    # input 32x32 -> 15 -> 7 -> 3 -> 1 after the four stride-2 convs
    x = jax.random.normal(kx, (2, 1, 32, 32), jnp.float32)
    label_idx = jax.random.randint(kl, (2,), 0, hp["no_classes"])
    inputlabel = jax.nn.one_hot(label_idx, hp["no_classes"], dtype=jnp.float32)
    trace = 0.1 * jax.random.uniform(kt, (hp["no_filters"], hp["no_classes"]),
                                     jnp.float32)

    fwd = jax.jit(lambda p, xx, lab, tr: network_forward(p, hp, xx, lab, tr))
    feat, activout, new_trace = fwd(params, x, inputlabel, trace)
    jax.block_until_ready((feat, activout, new_trace))

    rfeat, ractiv, rtrace = reference_forward(params, hp, x, inputlabel, trace)
    np.testing.assert_allclose(np.asarray(feat), np.asarray(rfeat), rtol=2e-2, atol=2e-2)
    np.testing.assert_allclose(np.asarray(activout), np.asarray(ractiv), rtol=2e-2, atol=2e-2)
    np.testing.assert_allclose(np.asarray(new_trace), np.asarray(rtrace), rtol=2e-2, atol=2e-2)

    print("KERNEL_OK")
</pallas_src>

<mosaic_0001>
module attributes {stable_mosaic.version = 11 : i64} {
  func.func @_fused_forward_kernel(%arg0: memref<9x882xf32, #tpu.memory_space<vmem>>, %arg1: memref<8x9xf32, #tpu.memory_space<vmem>>, %arg2: memref<8x1xf32, #tpu.memory_space<vmem>>, %arg3: memref<8x72xf32, #tpu.memory_space<vmem>>, %arg4: memref<8x1xf32, #tpu.memory_space<vmem>>, %arg5: memref<98x162xf32, #tpu.memory_space<vmem>>, %arg6: memref<8x72xf32, #tpu.memory_space<vmem>>, %arg7: memref<8x1xf32, #tpu.memory_space<vmem>>, %arg8: memref<18x18xf32, #tpu.memory_space<vmem>>, %arg9: memref<8x72xf32, #tpu.memory_space<vmem>>, %arg10: memref<8x1xf32, #tpu.memory_space<vmem>>, %arg11: memref<8x4xf32, #tpu.memory_space<vmem>>, %arg12: memref<8x4xf32, #tpu.memory_space<vmem>>, %arg13: memref<8x4xf32, #tpu.memory_space<vmem>>, %arg14: memref<2x4xf32, #tpu.memory_space<vmem>>, %arg15: memref<1xf32, #tpu.memory_space<smem>>, %arg16: memref<2x8xf32, #tpu.memory_space<vmem>>, %arg17: memref<2x4xf32, #tpu.memory_space<vmem>>, %arg18: memref<8x4xf32, #tpu.memory_space<vmem>>) attributes {dimension_semantics = [], scalar_prefetch = 0 : i64, scratch_operands = 0 : i64, tpu.core_type = #tpu.core_type<tc>} {
    %c0 = arith.constant 0 : index
    %c0_0 = arith.constant 0 : index
    %0 = vector.load %arg1[%c0, %c0_0] : memref<8x9xf32, #tpu.memory_space<vmem>>, vector<8x9xf32>
    %c0_1 = arith.constant 0 : index
    %c0_2 = arith.constant 0 : index
    %1 = vector.load %arg0[%c0_1, %c0_2] : memref<9x882xf32, #tpu.memory_space<vmem>>, vector<9x882xf32>
    %cst = arith.constant dense<0.000000e+00> : vector<8x882xf32>
    %2 = tpu.matmul %0, %1, %cst {dimension_numbers = #tpu.dot_dimension_numbers<[1], [0], [0], [1], [0, 0, 1, 1], [], []>} : vector<8x9xf32>, vector<9x882xf32>, vector<8x882xf32> -> vector<8x882xf32>
    %c0_3 = arith.constant 0 : index
    %c0_4 = arith.constant 0 : index
    %3 = vector.load %arg2[%c0_3, %c0_4] : memref<8x1xf32, #tpu.memory_space<vmem>>, vector<8x1xf32>
    %4 = vector.broadcast %3 : vector<8x1xf32> to vector<8x882xf32>
    %5 = arith.addf %2, %4 : vector<8x882xf32>
    %cst_5 = arith.constant 0.000000e+00 : f32
    %6 = vector.broadcast %cst_5 : f32 to vector<8x882xf32>
    %7 = arith.maximumf %5, %6 : vector<8x882xf32>
    %8 = vector.extract_strided_slice %7 {offsets = [0, 0], sizes = [8, 98], strides = [1, 1]} : vector<8x882xf32> to vector<8x98xf32>
    %9 = vector.extract_strided_slice %7 {offsets = [0, 98], sizes = [8, 98], strides = [1, 1]} : vector<8x882xf32> to vector<8x98xf32>
    %10 = vector.extract_strided_slice %7 {offsets = [0, 196], sizes = [8, 98], strides = [1, 1]} : vector<8x882xf32> to vector<8x98xf32>
    %11 = vector.extract_strided_slice %7 {offsets = [0, 294], sizes = [8, 98], strides = [1, 1]} : vector<8x882xf32> to vector<8x98xf32>
    %12 = vector.extract_strided_slice %7 {offsets = [0, 392], sizes = [8, 98], strides = [1, 1]} : vector<8x882xf32> to vector<8x98xf32>
    %13 = vector.extract_strided_slice %7 {offsets = [0, 490], sizes = [8, 98], strides = [1, 1]} : vector<8x882xf32> to vector<8x98xf32>
    %14 = vector.extract_strided_slice %7 {offsets = [0, 588], sizes = [8, 98], strides = [1, 1]} : vector<8x882xf32> to vector<8x98xf32>
    %15 = vector.extract_strided_slice %7 {offsets = [0, 686], sizes = [8, 98], strides = [1, 1]} : vector<8x882xf32> to vector<8x98xf32>
    %16 = vector.extract_strided_slice %7 {offsets = [0, 784], sizes = [8, 98], strides = [1, 1]} : vector<8x882xf32> to vector<8x98xf32>
    %17 = tpu.concatenate %8, %9, %10, %11, %12, %13, %14, %15, %16 in 0 : vector<8x98xf32>, vector<8x98xf32>, vector<8x98xf32>, vector<8x98xf32>, vector<8x98xf32>, vector<8x98xf32>, vector<8x98xf32>, vector<8x98xf32>, vector<8x98xf32> -> vector<72x98xf32>
    %c0_6 = arith.constant 0 : index
    %c0_7 = arith.constant 0 : index
    %18 = vector.load %arg3[%c0_6, %c0_7] : memref<8x72xf32, #tpu.memory_space<vmem>>, vector<8x72xf32>
    %cst_8 = arith.constant dense<0.000000e+00> : vector<8x98xf32>
    %19 = tpu.matmul %18, %17, %cst_8 {dimension_numbers = #tpu.dot_dimension_numbers<[1], [0], [0], [1], [0, 0, 1, 1], [], []>} : vector<8x72xf32>, vector<72x98xf32>, vector<8x98xf32> -> vector<8x98xf32>
    %c0_9 = arith.constant 0 : index
    %c0_10 = arith.constant 0 : index
    %20 = vector.load %arg4[%c0_9, %c0_10] : memref<8x1xf32, #tpu.memory_space<vmem>>, vector<8x1xf32>
    %21 = vector.broadcast %20 : vector<8x1xf32> to vector<8x98xf32>
    %22 = arith.addf %19, %21 : vector<8x98xf32>
    %cst_11 = arith.constant 0.000000e+00 : f32
    %23 = vector.broadcast %cst_11 : f32 to vector<8x98xf32>
    %24 = arith.maximumf %22, %23 : vector<8x98xf32>
    %c0_12 = arith.constant 0 : index
    %c0_13 = arith.constant 0 : index
    %25 = vector.load %arg5[%c0_12, %c0_13] : memref<98x162xf32, #tpu.memory_space<vmem>>, vector<98x162xf32>
    %cst_14 = arith.constant dense<0.000000e+00> : vector<8x162xf32>
    %26 = tpu.matmul %24, %25, %cst_14 {dimension_numbers = #tpu.dot_dimension_numbers<[1], [0], [0], [1], [0, 0, 1, 1], [], []>} : vector<8x98xf32>, vector<98x162xf32>, vector<8x162xf32> -> vector<8x162xf32>
    %27 = vector.extract_strided_slice %26 {offsets = [0, 0], sizes = [8, 18], strides = [1, 1]} : vector<8x162xf32> to vector<8x18xf32>
    %28 = vector.extract_strided_slice %26 {offsets = [0, 18], sizes = [8, 18], strides = [1, 1]} : vector<8x162xf32> to vector<8x18xf32>
    %29 = vector.extract_strided_slice %26 {offsets = [0, 36], sizes = [8, 18], strides = [1, 1]} : vector<8x162xf32> to vector<8x18xf32>
    %30 = vector.extract_strided_slice %26 {offsets = [0, 54], sizes = [8, 18], strides = [1, 1]} : vector<8x162xf32> to vector<8x18xf32>
    %31 = vector.extract_strided_slice %26 {offsets = [0, 72], sizes = [8, 18], strides = [1, 1]} : vector<8x162xf32> to vector<8x18xf32>
    %32 = vector.extract_strided_slice %26 {offsets = [0, 90], sizes = [8, 18], strides = [1, 1]} : vector<8x162xf32> to vector<8x18xf32>
    %33 = vector.extract_strided_slice %26 {offsets = [0, 108], sizes = [8, 18], strides = [1, 1]} : vector<8x162xf32> to vector<8x18xf32>
    %34 = vector.extract_strided_slice %26 {offsets = [0, 126], sizes = [8, 18], strides = [1, 1]} : vector<8x162xf32> to vector<8x18xf32>
    %35 = vector.extract_strided_slice %26 {offsets = [0, 144], sizes = [8, 18], strides = [1, 1]} : vector<8x162xf32> to vector<8x18xf32>
    %36 = tpu.concatenate %27, %28, %29, %30, %31, %32, %33, %34, %35 in 0 : vector<8x18xf32>, vector<8x18xf32>, vector<8x18xf32>, vector<8x18xf32>, vector<8x18xf32>, vector<8x18xf32>, vector<8x18xf32>, vector<8x18xf32>, vector<8x18xf32> -> vector<72x18xf32>
    %c0_15 = arith.constant 0 : index
    %c0_16 = arith.constant 0 : index
    %37 = vector.load %arg6[%c0_15, %c0_16] : memref<8x72xf32, #tpu.memory_space<vmem>>, vector<8x72xf32>
    %cst_17 = arith.constant dense<0.000000e+00> : vector<8x18xf32>
    %38 = tpu.matmul %37, %36, %cst_17 {dimension_numbers = #tpu.dot_dimension_numbers<[1], [0], [0], [1], [0, 0, 1, 1], [], []>} : vector<8x72xf32>, vector<72x18xf32>, vector<8x18xf32> -> vector<8x18xf32>
    %c0_18 = arith.constant 0 : index
    %c0_19 = arith.constant 0 : index
    %39 = vector.load %arg7[%c0_18, %c0_19] : memref<8x1xf32, #tpu.memory_space<vmem>>, vector<8x1xf32>
    %40 = vector.broadcast %39 : vector<8x1xf32> to vector<8x18xf32>
    %41 = arith.addf %38, %40 : vector<8x18xf32>
    %cst_20 = arith.constant 0.000000e+00 : f32
    %42 = vector.broadcast %cst_20 : f32 to vector<8x18xf32>
    %43 = arith.maximumf %41, %42 : vector<8x18xf32>
    %c0_21 = arith.constant 0 : index
    %c0_22 = arith.constant 0 : index
    %44 = vector.load %arg8[%c0_21, %c0_22] : memref<18x18xf32, #tpu.memory_space<vmem>>, vector<18x18xf32>
    %cst_23 = arith.constant dense<0.000000e+00> : vector<8x18xf32>
    %45 = tpu.matmul %43, %44, %cst_23 {dimension_numbers = #tpu.dot_dimension_numbers<[1], [0], [0], [1], [0, 0, 1, 1], [], []>} : vector<8x18xf32>, vector<18x18xf32>, vector<8x18xf32> -> vector<8x18xf32>
    %46 = vector.extract_strided_slice %45 {offsets = [0, 0], sizes = [8, 2], strides = [1, 1]} : vector<8x18xf32> to vector<8x2xf32>
    %47 = vector.extract_strided_slice %45 {offsets = [0, 2], sizes = [8, 2], strides = [1, 1]} : vector<8x18xf32> to vector<8x2xf32>
    %48 = vector.extract_strided_slice %45 {offsets = [0, 4], sizes = [8, 2], strides = [1, 1]} : vector<8x18xf32> to vector<8x2xf32>
    %49 = vector.extract_strided_slice %45 {offsets = [0, 6], sizes = [8, 2], strides = [1, 1]} : vector<8x18xf32> to vector<8x2xf32>
    %50 = vector.extract_strided_slice %45 {offsets = [0, 8], sizes = [8, 2], strides = [1, 1]} : vector<8x18xf32> to vector<8x2xf32>
    %51 = vector.extract_strided_slice %45 {offsets = [0, 10], sizes = [8, 2], strides = [1, 1]} : vector<8x18xf32> to vector<8x2xf32>
    %52 = vector.extract_strided_slice %45 {offsets = [0, 12], sizes = [8, 2], strides = [1, 1]} : vector<8x18xf32> to vector<8x2xf32>
    %53 = vector.extract_strided_slice %45 {offsets = [0, 14], sizes = [8, 2], strides = [1, 1]} : vector<8x18xf32> to vector<8x2xf32>
    %54 = vector.extract_strided_slice %45 {offsets = [0, 16], sizes = [8, 2], strides = [1, 1]} : vector<8x18xf32> to vector<8x2xf32>
    %55 = tpu.concatenate %46, %47, %48, %49, %50, %51, %52, %53, %54 in 0 : vector<8x2xf32>, vector<8x2xf32>, vector<8x2xf32>, vector<8x2xf32>, vector<8x2xf32>, vector<8x2xf32>, vector<8x2xf32>, vector<8x2xf32>, vector<8x2xf32> -> vector<72x2xf32>
    %c0_24 = arith.constant 0 : index
    %c0_25 = arith.constant 0 : index
    %56 = vector.load %arg9[%c0_24, %c0_25] : memref<8x72xf32, #tpu.memory_space<vmem>>, vector<8x72xf32>
    %cst_26 = arith.constant dense<0.000000e+00> : vector<8x2xf32>
    %57 = tpu.matmul %56, %55, %cst_26 {dimension_numbers = #tpu.dot_dimension_numbers<[1], [0], [0], [1], [0, 0, 1, 1], [], []>} : vector<8x72xf32>, vector<72x2xf32>, vector<8x2xf32> -> vector<8x2xf32>
    %c0_27 = arith.constant 0 : index
    %c0_28 = arith.constant 0 : index
    %58 = vector.load %arg10[%c0_27, %c0_28] : memref<8x1xf32, #tpu.memory_space<vmem>>, vector<8x1xf32>
    %59 = vector.broadcast %58 : vector<8x1xf32> to vector<8x2xf32>
    %60 = arith.addf %57, %59 : vector<8x2xf32>
    %cst_29 = arith.constant 0.000000e+00 : f32
    %61 = vector.broadcast %cst_29 : f32 to vector<8x2xf32>
    %62 = arith.maximumf %60, %61 : vector<8x2xf32>
    %63 = tpu.iota {dimensions = array<i32: 0>} : vector<8x8xi32>
    %64 = tpu.iota {dimensions = array<i32: 1>} : vector<8x8xi32>
    %65 = arith.cmpi eq, %63, %64 : vector<8x8xi32>
    %66 = arith.extui %65 : vector<8x8xi1> to vector<8x8xi32>
    %67 = arith.sitofp %66 : vector<8x8xi32> to vector<8x8xf32>
    %68 = vector.extract_strided_slice %62 {offsets = [0, 0], sizes = [8, 1], strides = [1, 1]} : vector<8x2xf32> to vector<8x1xf32>
    %69 = vector.broadcast %68 : vector<8x1xf32> to vector<8x8xf32>
    %70 = arith.mulf %67, %69 : vector<8x8xf32>
    %cst_30 = arith.constant dense<0.000000e+00> : vector<8xf32>
    %71 = vector.multi_reduction <add>, %70, %cst_30 [0] : vector<8x8xf32> to vector<8xf32>
    %72 = vector.shape_cast %71 : vector<8xf32> to vector<1x8xf32>
    %73 = vector.extract_strided_slice %62 {offsets = [0, 1], sizes = [8, 1], strides = [1, 1]} : vector<8x2xf32> to vector<8x1xf32>
    %74 = vector.broadcast %73 : vector<8x1xf32> to vector<8x8xf32>
    %75 = arith.mulf %67, %74 : vector<8x8xf32>
    %cst_31 = arith.constant dense<0.000000e+00> : vector<8xf32>
    %76 = vector.multi_reduction <add>, %75, %cst_31 [0] : vector<8x8xf32> to vector<8xf32>
    %77 = vector.shape_cast %76 : vector<8xf32> to vector<1x8xf32>
    %78 = tpu.concatenate %72, %77 in 0 : vector<1x8xf32>, vector<1x8xf32> -> vector<2x8xf32>
    %c0_32 = arith.constant 0 : index
    %c0_33 = arith.constant 0 : index
    %79 = vector.load %arg16[%c0_32, %c0_33] : memref<2x8xf32, #tpu.memory_space<vmem>>, vector<2x8xf32>
    tpu.vector_store %arg16[%c0_32, %c0_33], %78 {strides = array<i32>} : memref<2x8xf32, #tpu.memory_space<vmem>>, vector<2x8xf32>,
    %c0_34 = arith.constant 0 : index
    %c0_35 = arith.constant 0 : index
    %80 = vector.load %arg11[%c0_34, %c0_35] : memref<8x4xf32, #tpu.memory_space<vmem>>, vector<8x4xf32>
    %c0_36 = arith.constant 0 : index
    %c0_37 = arith.constant 0 : index
    %81 = vector.load %arg12[%c0_36, %c0_37] : memref<8x4xf32, #tpu.memory_space<vmem>>, vector<8x4xf32>
    %c0_38 = arith.constant 0 : index
    %c0_39 = arith.constant 0 : index
    %82 = vector.load %arg13[%c0_38, %c0_39] : memref<8x4xf32, #tpu.memory_space<vmem>>, vector<8x4xf32>
    %83 = arith.mulf %81, %82 : vector<8x4xf32>
    %84 = arith.addf %80, %83 : vector<8x4xf32>
    %cst_40 = arith.constant dense<0.000000e+00> : vector<2x4xf32>
    %85 = tpu.matmul %78, %84, %cst_40 {dimension_numbers = #tpu.dot_dimension_numbers<[1], [0], [0], [1], [0, 0, 1, 1], [], []>} : vector<2x8xf32>, vector<8x4xf32>, vector<2x4xf32> -> vector<2x4xf32>
    %c0_41 = arith.constant 0 : index
    %c0_42 = arith.constant 0 : index
    %86 = vector.load %arg14[%c0_41, %c0_42] : memref<2x4xf32, #tpu.memory_space<vmem>>, vector<2x4xf32>
    %cst_43 = arith.constant 1.000000e+03 : f32
    %87 = vector.broadcast %cst_43 : f32 to vector<2x4xf32>
    %88 = arith.mulf %87, %86 : vector<2x4xf32>
    %89 = arith.addf %85, %88 : vector<2x4xf32>
    %c0_44 = arith.constant 0 : index
    %c0_45 = arith.constant 0 : index
    %90 = vector.load %arg17[%c0_44, %c0_45] : memref<2x4xf32, #tpu.memory_space<vmem>>, vector<2x4xf32>
    tpu.vector_store %arg17[%c0_44, %c0_45], %89 {strides = array<i32>} : memref<2x4xf32, #tpu.memory_space<vmem>>, vector<2x4xf32>,
    %91 = vector.extract_strided_slice %62 {offsets = [0, 0], sizes = [8, 1], strides = [1, 1]} : vector<8x2xf32> to vector<8x1xf32>
    %92 = vector.extract_strided_slice %89 {offsets = [0, 0], sizes = [1, 4], strides = [1, 1]} : vector<2x4xf32> to vector<1x4xf32>
    %c0_46 = arith.constant 0 : index
    %93 = memref.load %arg15[%c0_46] : memref<1xf32, #tpu.memory_space<smem>>
    %c0_47 = arith.constant 0 : index
    %c0_48 = arith.constant 0 : index
    %94 = vector.load %arg13[%c0_47, %c0_48] : memref<8x4xf32, #tpu.memory_space<vmem>>, vector<8x4xf32>
    %95 = vector.broadcast %92 : vector<1x4xf32> to vector<8x4xf32>
    %96 = arith.mulf %94, %95 : vector<8x4xf32>
    %97 = vector.broadcast %91 : vector<8x1xf32> to vector<8x4xf32>
    %98 = arith.subf %97, %96 : vector<8x4xf32>
    %99 = vector.broadcast %93 : f32 to vector<8x4xf32>
    %100 = arith.mulf %99, %98 : vector<8x4xf32>
    %101 = vector.broadcast %92 : vector<1x4xf32> to vector<8x4xf32>
    %102 = arith.mulf %100, %101 : vector<8x4xf32>
    %103 = arith.addf %94, %102 : vector<8x4xf32>
    %c0_49 = arith.constant 0 : index
    %c0_50 = arith.constant 0 : index
    %104 = vector.load %arg18[%c0_49, %c0_50] : memref<8x4xf32, #tpu.memory_space<vmem>>, vector<8x4xf32>
    tpu.vector_store %arg18[%c0_49, %c0_50], %103 {strides = array<i32>} : memref<8x4xf32, #tpu.memory_space<vmem>>, vector<8x4xf32>,
    return
  }
}

</mosaic_0001>

<bundles_post_ra>
// kernel: _lambda_.1
= control target key start
LH: loop header
LB: loop body
LE: loop exit
PB: predicated region body
PF: predicated region fallthrough
CT: control target
= control target key end

     0   :  { %s1856_s0 = inlined_call_operand.vmem [shape: f32[9,882], index: 0, kind: input, shape index: {}]   ;;  %s1857_s1 = inlined_call_operand.vmem [shape: f32[8,9], index: 1, kind: input, shape index: {}]   ;;  %s1858_s2 = inlined_call_operand.vmem [shape: f32[8,1], index: 2, kind: input, shape index: {}]   ;;  %s1859_s3 = inlined_call_operand.vmem [shape: f32[8,72], index: 3, kind: input, shape index: {}]   ;;  %s1860_s4 = inlined_call_operand.vmem [shape: f32[8,1], index: 4, kind: input, shape index: {}]   ;;  %s1861_s5 = inlined_call_operand.vmem [shape: f32[98,162], index: 5, kind: input, shape index: {}]   ;;  %s1862_s6 = inlined_call_operand.vmem [shape: f32[8,72], index: 6, kind: input, shape index: {}]   ;;  %s1863_s7 = inlined_call_operand.vmem [shape: f32[8,1], index: 7, kind: input, shape index: {}]   ;;  %s1864_s8 = inlined_call_operand.vmem [shape: f32[18,18], index: 8, kind: input, shape index: {}]   ;;  %s1865_s9 = inlined_call_operand.vmem [shape: f32[8,72], index: 9, kind: input, shape index: {}]   ;;  %s1866_s10 = inlined_call_operand.vmem [shape: f32[8,1], index: 10, kind: input, shape index: {}]   ;;  %s1867_s11 = inlined_call_operand.vmem [shape: f32[8,4], index: 11, kind: input, shape index: {}]   ;;  %s1868_s12 = inlined_call_operand.vmem [shape: f32[8,4], index: 12, kind: input, shape index: {}]   ;;  %s1869_s13 = inlined_call_operand.vmem [shape: f32[8,4], index: 13, kind: input, shape index: {}]   ;;  %s1870_s14 = inlined_call_operand.vmem [shape: f32[2,4], index: 14, kind: input, shape index: {}]   ;;  %s1871_s15 = inlined_call_operand.<no memory space> [shape: f32[1], index: 15, kind: input, shape index: {}]   ;;  %s1872_s16 = inlined_call_operand.hbm [shape: f32[2,8], index: 16, kind: output, shape index: {0}]   ;;  %s1873_s17 = inlined_call_operand.hbm [shape: f32[2,4], index: 17, kind: output, shape index: {1}]   ;;  %s1874_s18 = inlined_call_operand.vmem [shape: f32[8,4], index: 18, kind: output, shape index: {2}]  }
   0x1   :  { %1876 = sst [smem:[#allocation9_spill]] %s1856_s0 }
   0x2   :  { %1877 = sst [smem:[#allocation10_spill]] %s1857_s1 }
   0x3   :  { %1878 = sst [smem:[#allocation11_spill]] %s1858_s2 }
   0x4   :  { %25 = vsyncpa [#allocation4], 0  ;;  %s1879_s29 = sld [smem:[#allocation9_spill]]  ;;  %vm84_vm0 = vcmask 1040384   ;;  %vm1447_vm1 = vmmov 1   ;;  %v1448_v7 = vmov 0.0  }
   0x5   :  { %vm1581_vm2 = vmpackc.low %vm84_vm0, %vm1447_vm1  ;;  %170 = vmatprep.mubr.f32.mxu0 %v1448_v7  ;;  %s1882_s23 = sld [smem:[#allocation10_spill]]  ;;  %v1449_v12 = vmov 0.0|0.0   ;;  %vm1450_vm3 = vmmov 0   ;;  %vm80_vm4 = vcmask 72704   ;;  %v1451_v22 = vmov 0   ;;  %s1883_s1 = sld [smem:[#allocation11_spill]] }
   0x6   :  { %1264 = vmatprep.subr.bf16.mxu1 %v1449_v12  ;;  %1166 = vmatprep.mubr.msk.f32.mxu1 %vm1450_vm3, %v1448_v7 }
   0x7   :  { %1360 = vset.pattern.permute.xlu0 %v1451_v22  ;;  %1391 = vset.pattern.permute.xlu1 %v1451_v22 }
   0xa   :  { %v61_v0 = vld [vmem:[%s1879_s29 + $0x8] sm:$0xff]  ;;  %v68_v1 = vld [vmem:[%s1879_s29 + $0x40] sm:$0x1]  ;;  %v67_v5 = vld [vmem:[%s1879_s29 + $0x38] sm:$0x1] }
   0xb   :  { %v60_v2 = vld [vmem:[%s1879_s29] sm:$0xff]  ;;  %v1246_v3 = vpack.c.bf16 %v68_v1, %v61_v0  ;;  %v63_v9 = vld [vmem:[%s1879_s29 + $0x18] sm:$0xff]  ;;  %v70_v10 = vld [vmem:[%s1879_s29 + $0x50] sm:$0x1] }
   0xc   :  { %v1249_v6 = vpack.c.bf16 %v67_v5, %v60_v2  ;;  %v59_v8 = vld [vmem:[%s1882_s23] sm:$0xff]  ;;  %v62_v11 = vld [vmem:[%s1879_s29 + $0x10] sm:$0xff]  ;;  %v1252_v13 = vpack.c.bf16 %v70_v10, %v63_v9  ;;  %v69_v14 = vld [vmem:[%s1879_s29 + $0x48] sm:$0x1] }
   0xd   :  { %1248 = vmatprep.subr.msk.bf16.mxu0 %vm1581_vm2, %v1246_v3  ;;  %v66_v15 = vld [vmem:[%s1879_s29 + $0x30] sm:$0xff]  ;;  %v73_v16 = vld [vmem:[%s1879_s29 + $0x68] sm:$0x1]  ;;  %v1255_v17 = vpack.c.bf16 %v69_v14, %v62_v11  ;;  %v72_v20 = vld [vmem:[%s1879_s29 + $0x60] sm:$0x1] }
   0xe   :  { %1251 = vmatpush1.bf16.msk.msra.mxu0 %vm1581_vm2, %v1249_v6  ;;  %v1265_v18 = vpack.c.bf16 %v73_v16, %v66_v15  ;;  %v65_v19 = vld [vmem:[%s1879_s29 + $0x28] sm:$0xff]  ;;  %v64_v21 = vld [vmem:[%s1879_s29 + $0x20] sm:$0xff]  ;;  %v71_v24 = vld [vmem:[%s1879_s29 + $0x58] sm:$0x1] }
   0xf   :  { %1254 = vmatprep.subr.msk.bf16.mxu0 %vm1581_vm2, %v1252_v13  ;;  %v1258_v23 = vpack.c.bf16 %v72_v20, %v65_v19  ;;  %v74_v25 = vld [vmem:[%s1883_s1] sm:$0xff] }
  0x10   :  { %26 = vsyncpa [#allocation6], 0  ;;  %1267 = vmatpush3.bf16.msk.msra.mxu1 %vm1581_vm2, %v1265_v18  ;;  %77 = vperm.xlu0 %1360, %v74_v25   ;;  %v1261_v26 = vpack.c.bf16 %v71_v24, %v64_v21  ;;  %s1452_s29 = smov 30   ;;  %s1453_s20 = smov 60   ;;  %v534_v56 = vld [vmem:[%s1861_s5 + $0x8] sm:$0xff]  ;;  %v536_v57 = vld [vmem:[%s1861_s5 + $0x18] sm:$0xff] }
  0x11   :  { %1104 = vmatmul.mubr.msk.f32.vlgmr.msra.gmra.mrb[0].mxu0 %vm80_vm4, %v59_v8  ;;  %s1454_s21 = smov 90   ;;  %s1455_s22 = smov 22   ;;  %v1280_v58 = vpack.c.bf16 %v536_v57, %v534_v56  ;;  %v533_v59 = vld [vmem:[%s1861_s5] sm:$0xff]  ;;  %v535_v60 = vld [vmem:[%s1861_s5 + $0x10] sm:$0xff]  ;;  %v538_v61 = vld [vmem:[%s1861_s5 + $0x28] sm:$0xff]  ;;  %vm402_vm5 = vcmask 244736  }
  0x12   :  { %1257 = vmatpush1.bf16.msk.msra.mxu0 %vm1581_vm2, %v1255_v17  ;;  %241 = vmatprep.mubr.f32.mxu0 %v1448_v7  ;;  %s1456_s2 = smov 120   ;;  %s1457_s23 = smov 52   ;;  %v1282_v62 = vpack.c.bf16 %v535_v60, %v533_v59  ;;  %v540_v63 = vld [vmem:[%s1861_s5 + $0x38] sm:$0xff]  ;;  %v537_v0 = vld [vmem:[%s1861_s5 + $0x20] sm:$0xff]  ;;  %v539_v1 = vld [vmem:[%s1861_s5 + $0x30] sm:$0xff]  ;;  %vm410_vm6 = vcmask 490496  }
  0x13   :  { %1260 = vmatprep.subr.msk.bf16.mxu0 %vm1581_vm2, %v1258_v23  ;;  %1167 = vmatmul.mubr.msk.f32.vlgmr.msra.gmra.mrb[0].mxu1 %vm80_vm4, %v59_v8  ;;  %s1458_s26 = smov 82   ;;  %s1459_s27 = smov 112   ;;  %v1284_v2 = vpack.c.bf16 %v540_v63, %v538_v61  ;;  %v542_v3 = vld [vmem:[%s1861_s5 + $0x48] sm:$0xff]  ;;  %v544_v4 = vld [vmem:[%s1861_s5 + $0x58] sm:$0xff]  ;;  %v452_v5 = vld [vmem:[%s1860_s4] sm:$0xff]  ;;  %v1286_v6 = vpack.c.bf16 %v539_v1, %v537_v0  ;;  %vm418_vm7 = vcmask 736256  }
  0x14   :  { %634 = vmatprep.mubr.f32.mxu1 %v1448_v7  ;;  %1281 = vmatprep.subr.bf16.mxu1 %v1280_v58  ;;  %v541_v9 = vld [vmem:[%s1861_s5 + $0x40] sm:$0xff]  ;;  %v543_v10 = vld [vmem:[%s1861_s5 + $0x50] sm:$0xff]  ;;  %v546_v11 = vld [vmem:[%s1861_s5 + $0x68] sm:$0xff]  ;;  %vm429_vm8 = vcmask 179200   ;;  %vm437_vm9 = vcmask 424960   ;;  %vm445_vm10 = vcmask 670720  }
  0x15   :  { %1107 = vmatmul.mubr.msk.f32.vlgmr.msra.gmra.mrb[2].mxu0 %vm80_vm4, %v59_v8  ;;  %1283 = vmatpush1.bf16.msra.mxu1 %v1282_v62  ;;  %v548_v13 = vld [vmem:[%s1861_s5 + $0x78] sm:$0xff]  ;;  %v1290_v14 = vpack.c.bf16 %v543_v10, %v541_v9  ;;  %v545_v16 = vld [vmem:[%s1861_s5 + $0x60] sm:$0xff]  ;;  %v547_v17 = vld [vmem:[%s1861_s5 + $0x70] sm:$0xff]  ;;  %vm458_vm11 = vcmask 588800   ;;  %vm563_vm12 = vcmask 1041408   ;;  %vm559_vm13 = vcmask 801792  }
  0x16   :  { %1263 = vmatpush1.bf16.msk.msra.mxu0 %vm1581_vm2, %v1261_v26  ;;  %312 = vmatprep.mubr.f32.mxu0 %v1448_v7  ;;  %v1292_v15 = vpack.c.bf16 %v548_v13, %v546_v11  ;;  %v550_v18 = vld [vmem:[%s1861_s5 + $0x88] sm:$0xff]  ;;  %v552_v19 = vld [vmem:[%s1861_s5 + $0x98] sm:$0xff]  ;;  %v1294_v20 = vpack.c.bf16 %v547_v17, %v545_v16  ;;  %v549_v22 = vld [vmem:[%s1861_s5 + $0x80] sm:$0xff]  ;;  %s1463_s4 = smov 74   ;;  %s1464_s28 = smov 38   ;;  %vm665_vm14 = vcmask 15360  }
  0x17   :  { %1268 = vmatprep.subr.bf16.mxu0 %v1449_v12  ;;  %1285 = vmatprep.subr.bf16.mxu1 %v1284_v2  ;;  %v1296_v21 = vpack.c.bf16 %v552_v19, %v550_v18  ;;  %v551_v23 = vld [vmem:[%s1861_s5 + $0x90] sm:$0xff]  ;;  %v554_v24 = vld [vmem:[%s1861_s5 + $0xa8] sm:$0xff]  ;;  %v556_v25 = vld [vmem:[%s1861_s5 + $0xb8] sm:$0xff]  ;;  %s1465_s30 = smov 2   ;;  %s1466_s0 = smov 20   ;;  %vm755_vm15 = vcmask 146432  }
  0x18   :  { %v1298_v26 = vpack.c.bf16 %v551_v23, %v549_v22  ;;  %v451_v60 = vld [vmem:[%s1859_s3] sm:$0xff]  ;;  %v558_v62 = vld [vmem:[%s1861_s5 + $0xc8] sm:$0x3]  ;;  %s1460_s3 = smov 92   ;;  %s1467_s25 = smov 124   ;;  %vm951_vm2 = vcmask 64512  }
  0x19   :  { %1110 = vmatmul.mubr.msk.f32.vlgmr.msra.gmra.mrb[4].mxu0 %vm80_vm4, %v59_v8  ;;  %v1288_v8 = vpack.c.bf16 %v544_v4, %v542_v3  ;;  %1287 = vmatpush1.bf16.msra.mxu1 %v1286_v6  ;;  %v557_v63 = vld [vmem:[%s1861_s5 + $0xc0] sm:$0x3] }
  0x1a   :  { %1187 = vmatprep.mubr.msk.f32.mxu0 %vm1450_vm3, %v1448_v7  ;;  %v672_v9 = vld [vmem:[%s1863_s7] sm:$0xff] }
  0x1b   :  { %1289 = vmatprep.subr.bf16.mxu1 %v1288_v8 }
  0x1d   :  { %1291 = vmatpush1.bf16.msra.mxu1 %v1290_v14 }
  0x1e   :  { %1293 = vmatprep.subr.bf16.mxu1 %v1292_v15 }
  0x21   :  { %1295 = vmatpush1.bf16.msra.mxu1 %v1294_v20 }
  0x22   :  { %1297 = vmatprep.subr.bf16.mxu1 %v1296_v21 }
  0x25   :  { %1299 = vmatpush1.bf16.msra.mxu1 %v1298_v26 }
  0x8f   :  { %v78_v27 = vpop.permute.xlu0 %77 }
  0xe4   :  { %v172_v28 = vpop.f32.mrb[0].mxu0 }
  0xe5   :  { %v1652_v29 = vadd.f32 %v172_v28, %v78_v27  ;;  %v174_v30 = vpop.f32.mrb[1].mxu0  ;;  %v553_v28 = vld [vmem:[%s1861_s5 + $0xa0] sm:$0xff] }
  0xe6   :  { %v175_v31 = vadd.f32 %v174_v30, %v78_v27  ;;  %v385_v32 = vpop.f32.mrb[0].mxu1  ;;  %v555_v30 = vld [vmem:[%s1861_s5 + $0xb0] sm:$0xff]  ;;  %s1462_s5 = smov 56  }
  0xe7   :  { %v389_v33 = vmax.f32 %v1652_v29, 0.0  ;;  %v1168_v34 = vpop.f32.mrb[1].mxu1  ;;  %v386_v43 = vadd.f32 %v385_v32, %v78_v27 }
  0xe8   :  { %v390_v35 = vmax.f32 %v175_v31, 0.0  ;;  %v243_v36 = vpop.f32.mrb[2].mxu0  ;;  %v1302_v31 = vpack.c.bf16 %v555_v30, %v553_v28  ;;  %v753_v28 = vld [vmem:[%s1864_s8 + $0x8] sm:$0xff] }
  0xe9   :  { %v244_v37 = vadd.f32 %v243_v36, %v78_v27  ;;  %v245_v38 = vpop.f32.mrb[3].mxu0  ;;  %v395_v51 = vmax.f32 %v386_v43, 0.0 }
  0xea   :  { %v1361_v39 = vpack.i.bf16 %v390_v35, %v389_v33  ;;  %v246_v40 = vadd.f32 %v245_v38, %v78_v27 }
  0xeb   :  { %v391_v41 = vmax.f32 %v244_v37, 0.0 }
  0xec   :  { %v392_v42 = vmax.f32 %v246_v40, 0.0  ;;  %v314_v44 = vpop.f32.mrb[4].mxu0  ;;  %1362 = vrot.lane.b32.xlu0 %v1361_v39, %s1452_s29 }
  0xed   :  { %v315_v45 = vadd.f32 %v314_v44, %v78_v27  ;;  %v316_v46 = vpop.f32.mrb[5].mxu0  ;;  %v1366_v47 = vpack.i.bf16 %v391_v41, %v390_v35 }
  0xee   :  { %v317_v48 = vadd.f32 %v316_v46, %v78_v27  ;;  %v1371_v49 = vpack.i.bf16 %v392_v42, %v391_v41  ;;  %v1300_v27 = vpack.c.bf16 %v556_v25, %v554_v24  ;;  %v671_v25 = vld [vmem:[%s1862_s6] sm:$0xff] }
  0xef   :  { %v393_v50 = vmax.f32 %v315_v45, 0.0  ;;  %1367 = vrot.lane.b32.xlu1 %v1366_v47, %s1453_s20 }
  0xf0   :  { %v394_v52 = vmax.f32 %v317_v48, 0.0  ;;  %1301 = vmatprep.subr.bf16.mxu1 %v1300_v27  ;;  %v752_v27 = vld [vmem:[%s1864_s8] sm:$0xff] }
  0xf1   :  { %v1376_v53 = vpack.i.bf16 %v393_v50, %v392_v42  ;;  %1303 = vmatpush1.bf16.msra.mxu1 %v1302_v31  ;;  %v1317_v30 = vpack.c.bf16 %v753_v28, %v752_v27  ;;  %v754_v31 = vld [vmem:[%s1864_s8 + $0x10] sm:$0x3]  ;;  %s1469_s8 = smov 122  }
  0xf2   :  { %v1386_v54 = vpack.i.bf16 %v395_v51, %v394_v52  ;;  %v1381_v55 = vpack.i.bf16 %v394_v52, %v393_v50  ;;  %1114 = vmatprep.subr.msk.mxu1 %vm563_vm12, %v558_v62  ;;  %v938_v62 = vlaneseq }
  0xf3   :  { %1372 = vrot.lane.b32.xlu1 %v1371_v49, %s1454_s21  ;;  %1377 = vrot.lane.b32.xlu0 %v1376_v53, %s1455_s22 }
  0xf5   :  { %1115 = vmatpush1.msk.msra.mxu1 %vm563_vm12, %v557_v63  ;;  %v939_v63 = vshrl.u32 %v938_v62, 7 }
  0xf6   :  { %1316 = vmatprep.subr.bf16.mxu1 %v1449_v12 }
  0xf7   :  { %421 = vrot.lane.b32.xlu1 %v392_v42, %s1456_s2  ;;  %1382 = vrot.lane.b32.xlu0 %v1381_v55, %s1457_s23 }
  0xfb   :  { %1387 = vrot.lane.b32.xlu1 %v1386_v54, %s1458_s26  ;;  %448 = vrot.lane.b32.xlu0 %v395_v51, %s1459_s27  ;;  %s1461_s26 = smov 110  }
  0xff   :  { %455 = vperm.xlu1 %1391, %v452_v5  }
 0x15e   :  { %v1363_v32 = vpop.permute.xlu0 %1362 }
 0x15f   :  { %v1365_v34 = vunpack.i.h.bf16 %v1363_v32  ;;  %v1364_v35 = vunpack.i.l.bf16 %v1363_v32 }
 0x161   :  { %v403_v36 = vsel %vm402_vm5, %v1364_v35, %v1365_v34  ;;  %v1368_v37 = vpop.permute.xlu1 %1367 }
 0x162   :  { %v1269_v38 = vpack.c.bf16 %v403_v36, %v389_v33  ;;  %v1370_v39 = vunpack.i.h.bf16 %v1368_v37  ;;  %v1369_v40 = vunpack.i.l.bf16 %v1368_v37 }
 0x164   :  { %1270 = vmatpush3.bf16.msra.mxu0 %v1269_v38  ;;  %v411_v47 = vsel %vm410_vm6, %v1369_v40, %v1370_v39  ;;  %v858_v40 = vld [vmem:[%s1866_s10] sm:$0xff] }
 0x165   :  { %v1373_v41 = vpop.permute.xlu1 %1372  ;;  %v1378_v42 = vpop.permute.xlu0 %1377  ;;  %1271 = vmatprep.subr.bf16.mxu0 %v1449_v12 }
 0x166   :  { %v1375_v43 = vunpack.i.h.bf16 %v1373_v41  ;;  %v1374_v44 = vunpack.i.l.bf16 %v1373_v41  ;;  %v1380_v45 = vunpack.i.h.bf16 %v1378_v42  ;;  %v1379_v46 = vunpack.i.l.bf16 %v1378_v42 }
 0x168   :  { %v419_v48 = vsel %vm418_vm7, %v1374_v44, %v1375_v43  ;;  %v430_v33 = vsel %vm429_vm8, %v1379_v46, %v1380_v45 }
 0x169   :  { %v1272_v49 = vpack.c.bf16 %v419_v48, %v411_v47  ;;  %v422_v50 = vpop.permute.xlu1 %421  ;;  %v1383_v29 = vpop.permute.xlu0 %1382 }
 0x16a   :  { %v1385_v51 = vunpack.i.h.bf16 %v1383_v29  ;;  %v1384_v52 = vunpack.i.l.bf16 %v1383_v29  ;;  %v1275_v53 = vpack.c.bf16 %v430_v33, %v422_v50  ;;  %v857_v33 = vld [vmem:[%s1865_s9] sm:$0xff] }
 0x16b   :  { %1273 = vmatpush3.bf16.msra.mxu0 %v1272_v49 }
 0x16c   :  { %1274 = vmatprep.subr.bf16.mxu0 %v1449_v12  ;;  %v438_v57 = vsel %vm437_vm9, %v1384_v52, %v1385_v51  ;;  %v1473_v52 = vmov 1  }
 0x16d   :  { %v1388_v54 = vpop.permute.xlu1 %1387  ;;  %v449_v61 = vpop.permute.xlu0 %448 }
 0x16e   :  { %v1390_v55 = vunpack.i.h.bf16 %v1388_v54  ;;  %v1389_v56 = vunpack.i.l.bf16 %v1388_v54 }
 0x16f   :  { %1276 = vmatpush3.bf16.msra.mxu0 %v1275_v53 }
 0x170   :  { %v446_v58 = vsel %vm445_vm10, %v1389_v56, %v1390_v55  ;;  %1277 = vmatprep.subr.bf16.mxu0 %v1449_v12 }
 0x171   :  { %v1278_v59 = vpack.c.bf16 %v446_v58, %v438_v57  ;;  %v1806_v58 = vld [vmem:[%s1869_s13] sm:$0xff] }
 0x173   :  { %1279 = vmatpush3.bf16.msra.mxu0 %v1278_v59 }
 0x174   :  { %1185 = vmatprep.subr.mxu0 %v1448_v7 }
 0x177   :  { %1186 = vmatpush3.msra.mxu0 %v449_v61 }
 0x178   :  { %1188 = vmatmul.mubr.msk.f32.vlgmr.msra.gmra.mrb[6].mxu0 %vm458_vm11, %v451_v60  ;;  %1304 = vmatprep.subr.bf16.mxu0 %v1449_v12  ;;  %v974_v60 = vld [vmem:[%s1867_s11] sm:$0xff]  ;;  %s1474_s11 = smov [#allocation3]  }
 0x179   :  { %1208 = vmatprep.mubr.msk.f32.mxu0 %vm1450_vm3, %v1448_v7 }
 0x17e   :  { %v456_v0 = vpop.permute.xlu1 %455 }
 0x24b   :  { %v528_v1 = vpop.f32.mrb[6].mxu0 }
 0x24c   :  { %v529_v2 = vadd.f32 %v528_v1, %v456_v0  ;;  %v1189_v3 = vpop.f32.mrb[7].mxu0  ;;  %v941_v0 = vand.u32 127, %v938_v62 }
 0x24e   :  { %v532_v4 = vmax.f32 %v529_v2, 0.0  ;;  %vm942_vm1 = vcmp.eq.s32.totalorder %v939_v63, %v941_v0 }
 0x24f   :  { %v1121_v1 = vsel %vm942_vm1, 1.0, %v1448_v7 }
 0x250   :  { %1116 = vmatmul.mubr.msk.f32.vlgmr.msra.gmra.mrb[2].mxu1 %vm559_vm13, %v532_v4 }
 0x251   :  { %1217 = vmatprep.mubr.msk.f32.mxu1 %vm1450_vm3, %v1448_v7  ;;  %1318 = vmatpush3.bf16.msra.mxu1 %v1317_v30 }
 0x252   :  { %1215 = vmatprep.subr.mxu1 %v1448_v7 }
 0x255   :  { %1216 = vmatpush3.msk.msra.mxu1 %vm563_vm12, %v754_v31 }
 0x256   :  { %1319 = vmatprep.subr.bf16.mxu1 %v1449_v12 }
 0x323   :  { %v636_v5 = vpop.f32.mrb[2].mxu1 }
 0x324   :  { %645 = vrot.lane.b32.xlu1 %v636_v5, %s1460_s3  ;;  %642 = vrot.lane.b32.xlu0 %v636_v5, %s1461_s26  ;;  %v638_v6 = vpop.f32.mrb[3].mxu1  ;;  %s1468_s3 = smov 126   ;;  %s1470_s26 = smov 116  }
 0x325   :  { %v1392_v8 = vpack.i.bf16 %v638_v6, %v636_v5 }
 0x328   :  { %651 = vrot.lane.b32.xlu1 %v636_v5, %s1462_s5  ;;  %648 = vrot.lane.b32.xlu0 %v636_v5, %s1463_s4  ;;  %s1471_s5 = smov 118   ;;  %s1472_s4 = smov 114  }
 0x32c   :  { %654 = vrot.lane.b32.xlu0 %v636_v5, %s1464_s28  ;;  %1393 = vrot.lane.b32.xlu1 %v1392_v8, %s1465_s30 }
 0x330   :  { %657 = vrot.lane.b32.xlu0 %v636_v5, %s1466_s0  ;;  %668 = vrot.lane.b32.xlu1 %v638_v6, %s1459_s27 }
 0x334   :  { %675 = vperm.xlu0 %1360, %v672_v9  }
 0x396   :  { %v646_v10 = vpop.permute.xlu1 %645  ;;  %v643_v11 = vpop.permute.xlu0 %642 }
 0x397   :  { %v1305_v13 = vpack.c.bf16 %v643_v11, %v636_v5 }
 0x399   :  { %1306 = vmatpush3.bf16.msra.mxu0 %v1305_v13 }
 0x39a   :  { %v652_v14 = vpop.permute.xlu1 %651  ;;  %v649_v15 = vpop.permute.xlu0 %648  ;;  %1307 = vmatprep.subr.bf16.mxu0 %v1449_v12 }
 0x39b   :  { %v1308_v16 = vpack.c.bf16 %v649_v15, %v646_v10 }
 0x39d   :  { %1309 = vmatpush3.bf16.msra.mxu0 %v1308_v16 }
 0x39e   :  { %v655_v17 = vpop.permute.xlu0 %654  ;;  %v1394_v18 = vpop.permute.xlu1 %1393  ;;  %1310 = vmatprep.subr.bf16.mxu0 %v1449_v12 }
 0x39f   :  { %v1311_v19 = vpack.c.bf16 %v655_v17, %v652_v14  ;;  %v1396_v20 = vunpack.i.h.bf16 %v1394_v18  ;;  %v1395_v21 = vunpack.i.l.bf16 %v1394_v18 }
 0x3a1   :  { %1312 = vmatpush3.bf16.msra.mxu0 %v1311_v19  ;;  %v666_v22 = vsel %vm665_vm14, %v1395_v21, %v1396_v20 }
 0x3a2   :  { %v658_v23 = vpop.permute.xlu0 %657  ;;  %1313 = vmatprep.subr.bf16.mxu0 %v1449_v12  ;;  %v669_v26 = vpop.permute.xlu1 %668 }
 0x3a3   :  { %v1314_v24 = vpack.c.bf16 %v666_v22, %v658_v23 }
 0x3a5   :  { %1315 = vmatpush3.bf16.msra.mxu0 %v1314_v24 }
 0x3a6   :  { %1206 = vmatprep.subr.mxu0 %v1448_v7 }
 0x3a9   :  { %1207 = vmatpush3.msra.mxu0 %v669_v26 }
 0x3aa   :  { %1209 = vmatmul.mubr.msk.f32.vlgmr.msra.gmra.mrb[8].mxu0 %vm458_vm11, %v671_v25  ;;  %1241 = vmatprep.subr.mxu0 %v1448_v7 }
 0x3ab   :  { %1243 = vmatprep.mubr.msk.f32.mxu0 %vm1450_vm3, %v1448_v7 }
 0x3b3   :  { %v676_v32 = vpop.permute.xlu0 %675 }
 0x47d   :  { %v747_v34 = vpop.f32.mrb[8].mxu0 }
 0x47e   :  { %v748_v35 = vadd.f32 %v747_v34, %v676_v32  ;;  %v1210_v36 = vpop.f32.mrb[9].mxu0 }
 0x480   :  { %v751_v37 = vmax.f32 %v748_v35, 0.0 }
 0x482   :  { %1218 = vmatmul.mubr.msk.f32.vlgmr.msra.gmra.mrb[4].mxu1 %vm755_vm15, %v751_v37 }
 0x483   :  { %1238 = vmatprep.mubr.msk.f32.mxu1 %vm1450_vm3, %v1448_v7  ;;  %vm972_vm3 = vcmask 58368  }
 0x555   :  { %v828_v38 = vpop.f32.mrb[4].mxu1 }
 0x556   :  { %836 = vrot.lane.b32.xlu0 %v828_v38, %s1467_s25  ;;  %833 = vrot.lane.b32.xlu1 %v828_v38, %s1468_s3  ;;  %v1219_v39 = vpop.f32.mrb[5].mxu1 }
 0x55a   :  { %842 = vrot.lane.b32.xlu0 %v828_v38, %s1456_s2  ;;  %839 = vrot.lane.b32.xlu1 %v828_v38, %s1469_s8 }
 0x55e   :  { %848 = vrot.lane.b32.xlu0 %v828_v38, %s1470_s26  ;;  %845 = vrot.lane.b32.xlu1 %v828_v38, %s1471_s5 }
 0x562   :  { %854 = vrot.lane.b32.xlu0 %v828_v38, %s1459_s27  ;;  %851 = vrot.lane.b32.xlu1 %v828_v38, %s1472_s4 }
 0x566   :  { %861 = vperm.xlu1 %1391, %v858_v40  }
 0x56a   :  { %1397 = vset.pattern.permute.xlu1 %v1473_v52 }
 0x5c8   :  { %v837_v41 = vpop.permute.xlu0 %836  ;;  %v834_v42 = vpop.permute.xlu1 %833 }
 0x5c9   :  { %v1320_v43 = vpack.c.bf16 %v834_v42, %v828_v38 }
 0x5cb   :  { %1321 = vmatpush3.bf16.msra.mxu1 %v1320_v43 }
 0x5cc   :  { %v840_v44 = vpop.permute.xlu1 %839  ;;  %1322 = vmatprep.subr.bf16.mxu1 %v1449_v12  ;;  %v843_v46 = vpop.permute.xlu0 %842 }
 0x5cd   :  { %v1323_v45 = vpack.c.bf16 %v840_v44, %v837_v41 }
 0x5cf   :  { %1324 = vmatpush3.bf16.msra.mxu1 %v1323_v45 }
 0x5d0   :  { %v846_v47 = vpop.permute.xlu1 %845  ;;  %1325 = vmatprep.subr.bf16.mxu1 %v1449_v12  ;;  %v849_v49 = vpop.permute.xlu0 %848 }
 0x5d1   :  { %v1326_v48 = vpack.c.bf16 %v846_v47, %v843_v46 }
 0x5d3   :  { %1327 = vmatpush3.bf16.msra.mxu1 %v1326_v48 }
 0x5d4   :  { %v852_v50 = vpop.permute.xlu1 %851  ;;  %1328 = vmatprep.subr.bf16.mxu1 %v1449_v12  ;;  %v855_v51 = vpop.permute.xlu0 %854  ;;  %v975_v12 = vld [vmem:[%s1868_s12] sm:$0xff]  ;;  %s1076_s12 = sshll.u32 %s1474_s11, 4  ;;  %s1077_s12 = int_to_ptr.vmem [resolvable:$true] %s1076_s12 }
 0x5d5   :  { %v1329_v29 = vpack.c.bf16 %v852_v50, %v849_v49  ;;  %v977_v59 = vmul.f32 %v1806_v58, %v975_v12  ;;  %s1399_s13 = scalar_lea.vmem %s1077_s12, 32  ;;  %p1404_p1 = scmp.lt.s32.totalorder %s1077_s12, %s1077_s12 }
 0x5d6   :  { %p1400_p0 = scmp.ne.s32.totalorder %s1077_s12, %s1399_s13  ;;  %p1405_p2 = scmp.lt.s32.totalorder %s1399_s13, %s1399_s13 }
 0x5d7   :  { %1330 = vmatpush3.bf16.msra.mxu1 %v1329_v29  ;;  %v978_v61 = vadd.f32 %v977_v59, %v974_v60 }
 0x5d8   :  { %1236 = vmatprep.subr.mxu1 %v1448_v7  ;;  %p1406_p3 = por %p1405_p2, %p1404_p1 }
 0x5d9   :  { %1242 = vmatpush3.msra.mxu0 %v978_v61 }
 0x5da   :  { %p1407_p4 = pnand %p1406_p3, %p1400_p0 }
 0x5db   :  { %1237 = vmatpush3.msra.mxu1 %v855_v51 }
 0x5dc   :  { %1239 = vmatmul.mubr.msk.f32.vlgmr.msra.gmra.mrb[6].mxu1 %vm458_vm11, %v857_v33 }
 0x5e5   :  { %v862_v53 = vpop.permute.xlu1 %861 }
 0x6af   :  { %v933_v54 = vpop.f32.mrb[6].mxu1 }
 0x6b0   :  { %v934_v55 = vadd.f32 %v933_v54, %v862_v53  ;;  %v1240_v56 = vpop.f32.mrb[7].mxu1 }
 0x6b2   :  { %v937_v57 = vmax.f32 %v934_v55, 0.0 }
 0x6b4   :  { %960 = vperm.xlu1 %1397, %v937_v57   ;;  %947 = vperm.xlu0 %1360, %v937_v57  }
 0x6b8   :  { %1398 = vset.pattern.permute.xlu0 %v1473_v52 }
 0x733   :  { %v961_v2 = vpop.permute.xlu1 %960  ;;  %v1813_v3 = vpop.permute.xlu0 %947 }
 0x734   :  { %v963_v4 = vmul.f32 %v1121_v1, %v961_v2  ;;  %v950_v5 = vmul.f32 %v1121_v1, %v1813_v3 }
 0x736   :  { %v964_v6 = vsel %vm951_vm2, %v963_v4, 0.0  ;;  %v952_v8 = vsel %vm951_vm2, %v950_v5, 0.0 }
 0x737   :  { %v965_v9 = vrot.slane %v964_v6, 4  ;;  %v953_v10 = vrot.slane %v952_v8, 4 }
 0x739   :  { %v966_v11 = vadd.f32 %v965_v9, %v964_v6  ;;  %v954_v13 = vadd.f32 %v953_v10, %v952_v8 }
 0x73b   :  { %v967_v14 = vrot.slane %v966_v11, 2  ;;  %v955_v15 = vrot.slane %v954_v13, 2 }
 0x73d   :  { %v968_v16 = vadd.f32 %v967_v14, %v966_v11  ;;  %v956_v17 = vadd.f32 %v955_v15, %v954_v13 }
 0x73f   :  { %v969_v7 = vrot.slane %v968_v16, 1  ;;  %v957_v18 = vrot.slane %v956_v17, 1 }
 0x741   :  { %v970_v19 = vadd.f32 %v969_v7, %v968_v16  ;;  %v958_v20 = vadd.f32 %v957_v18, %v956_v17 }
 0x743   :  { %v971_v21 = vsel %vm84_vm0, %v958_v20, %v970_v19 }
 0x744   :  { %1244 = vmatmul.mubr.msk.f32.vlgmr.msra.gmra.mrb[10].mxu0 %vm951_vm2, %v971_v21  ;;  %973 = vst.msk [vmem:[#allocation3] sm:$0x3] %vm972_vm3, %v971_v21 }
 0x745   :  { %1410 = shalt.err (!%p1407_p4)
}
 0x746   :  { %s1411_s21 = scalar_lea.hbm %s1872_s16, 32 }
 0x747   :  { %p1412_p5 = scmp.ne.s32.totalorder %s1872_s16, %s1411_s21  ;;  %p1415_p6 = scmp.lt.u32.totalorder %s1411_s21, %s1872_s16 }
 0x749   :  { %p1417_p7 = pnand %p1415_p6, %p1412_p5 }
 0x74b   :  { %1420 = shalt.err (!%p1417_p7)
}
 0x74c   :  { %1079 = dma.vmem_to_hbm [thread:$0]  %s1077_s12, 32, %s1872_s16, [#allocation4]   ;;  %v979_v22 = vld [vmem:[%s1870_s14] sm:$0x3]  ;;  %v1060_v24 = vsub.s32 0, %v939_v63  ;;  %vm1054_vm0 = vcmask 25600  }
 0x74d   :  { %v980_v23 = vmul.f32 1000.0, %v979_v22  ;;  %s1475_s5 = smov [#allocation5]  }
 0x74e   :  { %s1086_s4 = sshll.u32 %s1475_s5, 4  ;;  %s1087_s4 = int_to_ptr.vmem [resolvable:$true] %s1086_s4 }
 0x74f   :  { %s1421_s28 = scalar_lea.vmem %s1087_s4, 32  ;;  %p1426_p9 = scmp.lt.s32.totalorder %s1087_s4, %s1087_s4 }
 0x750   :  { %p1422_p8 = scmp.ne.s32.totalorder %s1087_s4, %s1421_s28  ;;  %p1427_p10 = scmp.lt.s32.totalorder %s1421_s28, %s1421_s28 }
 0x752   :  { %p1428_p11 = por %p1427_p10, %p1426_p9 }
 0x754   :  { %p1429_p12 = pnand %p1428_p11, %p1422_p8 }
 0x817   :  { %v1050_v25 = vpop.f32.mrb[10].mxu0 }
 0x818   :  { %v1051_v26 = vadd.f32 %v1050_v25, %v980_v23  ;;  %v1245_v27 = vpop.f32.mrb[11].mxu0 }
 0x81a   :  { %v1061_v28 = vrot.slane %v1051_v26, %v1060_v24  ;;  %1055 = vst.msk [vmem:[#allocation5] sm:$0x3] %vm1054_vm0, %v1051_v26 }
 0x81b   :  { %1432 = shalt.err (!%p1429_p12)
}
 0x81c   :  { %s1433_s30 = scalar_lea.hbm %s1873_s17, 32 }
 0x81d   :  { %p1434_p13 = scmp.ne.s32.totalorder %s1873_s17, %s1433_s30  ;;  %p1437_p0 = scmp.lt.u32.totalorder %s1433_s30, %s1873_s17 }
 0x81f   :  { %p1439_p1 = pnand %p1437_p0, %p1434_p13 }
 0x821   :  { %1442 = shalt.err (!%p1439_p1)
}
 0x822   :  { %1089 = dma.vmem_to_hbm [thread:$0]  %s1087_s4, 32, %s1873_s17, [#allocation6]   ;;  %v1062_v30 = vmul.f32 %v1061_v28, %v1806_v58  ;;  %v1064_v31 = vstv %s1871_s15  ;;  %vm1068_vm4 = vcmask 31744  }
 0x824   :  { %v1063_v32 = vsub.f32 %v1813_v3, %v1062_v30 }
 0x826   :  { %v1065_v34 = vmul.f32 %v1064_v31, %v1063_v32 }
 0x828   :  { %v1066_v35 = vmul.f32 %v1065_v34, %v1061_v28 }
 0x82a   :  { %v1067_v36 = vadd.f32 %v1066_v35, %v1806_v58 }
 0x82c   :  { %1069 = vst.msk [vmem:[%s1874_s18] sm:$0xff] %vm1068_vm4, %v1067_v36 }
 0x82d   :  { %1443 = dma.done.wait [#allocation4], 32  }
 0x82e   :  { %1444 = vsyncadd [#allocation4], 4294967264 }
 0x82f   :  { %1445 = dma.done.wait [#allocation6], 32  }
 0x830   :  { %1446 = vsyncadd [#allocation6], 4294967264 }
 0x831   :  { %1100 = vsyncpa [#allocation4], 1 }
 0x832   :  { %1101 = vsyncpa [#allocation6], 1 }

</bundles_post_ra>
